<compile_context>
chip_gen: v6e
topology: v6e:2x2x1
jax: 0.10.0
libtpu: 0.0.40
codegen_flags: <defaults>
</compile_context>

<pallas_src>
import functools

import jax
import jax.numpy as jnp
from jax.experimental import pallas as pl
from jax.experimental.pallas import tpu as pltpu


# ---------------------------------------------------------------------------
# Kernel
# ---------------------------------------------------------------------------
def _mlp_kernel(p_ref, x_ref, o_ref, *, compute_dtype):
    # p_ref: (33,) f32 in SMEM, packed as
    #   w1[0:4] | b1[4:8] | w2[(in,out) row-major, 8:24] | b2[24:28]
    #   | w3[28:32] | b3[32]
    # x_ref / o_ref: (BR, BC) f32 blocks, batch lane-dense.
    cdt = compute_dtype

    # Hoist ALL scalar loads (SMEM -> sreg -> splat) once per grid step.
    w1 = [p_ref[j].astype(cdt) for j in range(4)]
    b1 = [p_ref[4 + j].astype(cdt) for j in range(4)]
    w2 = [[p_ref[8 + 4 * i + j].astype(cdt) for j in range(4)] for i in range(4)]
    b2 = [p_ref[24 + j].astype(cdt) for j in range(4)]
    w3 = [p_ref[28 + j].astype(cdt) for j in range(4)]
    b3 = p_ref[32].astype(cdt)

    x = x_ref[...].astype(cdt)

    # layer 1: in_features = 1  ->  4 broadcast FMAs + 4 tanh (VPU + EUP).
    h1 = [jnp.tanh(x * w1[j] + b1[j]) for j in range(4)]

    # layer 2: 4 -> 4  ->  16 broadcast FMAs + 4 tanh.
    h2 = []
    for j in range(4):
        s = h1[0] * w2[0][j] + b2[j]
        for i in range(1, 4):
            s = s + h1[i] * w2[i][j]
        h2.append(jnp.tanh(s))

    # layer 3: 4 -> 1  ->  4 broadcast FMAs + bias.
    out = h2[0] * w3[0]
    for j in range(1, 4):
        out = out + h2[j] * w3[j]
    o_ref[...] = (out + b3).astype(o_ref.dtype)


# ---------------------------------------------------------------------------
# Tiling / wrapper
# ---------------------------------------------------------------------------
def _choose_tiling(B):
    """Pick a lane-dense (BR, BC) block for a batch of B elements.

    Grows toward (256, 1024) = 1 MiB f32 so per-step compute dominates the
    fixed per-step pipeline overhead; keeps >= 2 grid steps when B allows so
    a 'parallel' grid axis can feed both of v7x's TensorCores.
    BC is always a multiple of 128 and BR a multiple of 8 (vreg tiling).
    """
    bc = 1024
    while bc > 128 and B <= bc * 8:
        bc //= 2
    br = 8
    while br < 256 and B >= 2 * (br * 2) * bc:
        br *= 2
    return br, bc


def _pack_params(params):
    """Pack the six tiny parameter arrays into one (33,) f32 SMEM vector."""
    return jnp.concatenate([
        params["w1"].reshape(-1).astype(jnp.float32),   # [0:4]
        params["b1"].reshape(-1).astype(jnp.float32),   # [4:8]
        params["w2"].reshape(-1).astype(jnp.float32),   # [8:24]  (in,out) row-major
        params["b2"].reshape(-1).astype(jnp.float32),   # [24:28]
        params["w3"].reshape(-1).astype(jnp.float32),   # [28:32]
        params["b3"].reshape(-1).astype(jnp.float32),   # [32]
    ])


def mlp_forward(x, params, *, compute_dtype=jnp.float32):
    """x: (B, 1) float32. params: w1 (4,), b1 (4,), w2 (4,4) [in,out],
    b2 (4,), w3 (4,), b3 (1,).

    compute_dtype: keep f32 by default (exact reference numerics).  bf16 is a
    valid throughput knob on v6e/v7x only (v5e has no bf16 VPU/EUP) and
    loosens tolerances.
    """
    B = x.shape[0]

    BR, BC = _choose_tiling(B)
    BLOCK = BR * BC
    n_blocks = (B + BLOCK - 1) // BLOCK
    padded = n_blocks * BLOCK

    x_flat = x.reshape(B)                   # in_features == 1; contiguous, free
    if padded != B:
        # Only non-block-aligned batches pay this copy; block-aligned batches
        # go straight to a free contiguous reshape.
        x_flat = jnp.pad(x_flat, (0, padded - B))
    x2d = x_flat.reshape(n_blocks * BR, BC)

    pvec = _pack_params(params)

    out2d = pl.pallas_call(
        functools.partial(_mlp_kernel, compute_dtype=compute_dtype),
        out_shape=jax.ShapeDtypeStruct((n_blocks * BR, BC), jnp.float32),
        grid=(n_blocks,),
        in_specs=[
            pl.BlockSpec(memory_space=pltpu.MemorySpace.SMEM),   # packed params
            pl.BlockSpec((BR, BC), lambda i: (i, 0)),            # x (lane-dense)
        ],
        out_specs=pl.BlockSpec((BR, BC), lambda i: (i, 0)),
        compiler_params=pltpu.CompilerParams(
            dimension_semantics=("parallel",),
            vmem_limit_bytes=32 * 1024 * 1024,
        ),
    )(pvec, x2d)

    out_flat = out2d.reshape(padded)
    if padded != B:
        out_flat = out_flat[:B]
    return out_flat.reshape(B, 1)


# ---------------------------------------------------------------------------
# Params / reference
# ---------------------------------------------------------------------------
def init_params(key):
    """Deterministic init mimicking torch's default uniform(-1/sqrt(fan_in), ...)."""
    ks = jax.random.split(key, 6)

    def unif(k, shape, fan_in):
        bound = 1.0 / jnp.sqrt(jnp.float32(fan_in))
        return jax.random.uniform(k, shape, jnp.float32, -bound, bound)

    return {
        "w1": unif(ks[0], (4,), 1),        # layer1.weight (4,1) squeezed
        "b1": unif(ks[1], (4,), 1),
        "w2": unif(ks[2], (4, 4), 4),      # stored as (in, out)
        "b2": unif(ks[3], (4,), 4),
        "w3": unif(ks[4], (4,), 4),        # layer3.weight (1,4) squeezed
        "b3": unif(ks[5], (1,), 4),
    }


def reference_forward(x, p):
    h1 = jnp.tanh(x @ p["w1"].reshape(1, 4) + p["b1"])
    h2 = jnp.tanh(h1 @ p["w2"] + p["b2"])
    return h2 @ p["w3"].reshape(4, 1) + p["b3"]


if __name__ == "__main__":
    key = jax.random.PRNGKey(0)
    pkey, xkey = jax.random.split(key)

    params = init_params(pkey)
    x = jax.random.normal(xkey, (8, 1), jnp.float32)     # batch=8, in_features=1

    out = mlp_forward(x, params)
    out = jax.block_until_ready(out)

    ref = reference_forward(x, params)
    assert out.shape == (8, 1)
    assert jnp.allclose(out, ref, atol=1e-5, rtol=1e-5)

    print("KERNEL_OK")
</pallas_src>

<mosaic_0001>
module attributes {stable_mosaic.version = 11 : i64} {
  func.func @_mlp_kernel(%arg0: i32, %arg1: memref<33xf32, #tpu.memory_space<smem>>, %arg2: memref<8x128xf32, #tpu.memory_space<vmem>>, %arg3: memref<8x128xf32, #tpu.memory_space<vmem>>) attributes {dimension_semantics = [#tpu.dimension_semantics<parallel>], iteration_bounds = array<i64: 1>, scalar_prefetch = 0 : i64, scratch_operands = 0 : i64, tpu.core_type = #tpu.core_type<tc>, window_params = [{transform_indices = @transform_0, window_bounds = array<i64: 33>}, {transform_indices = @transform_1, window_bounds = array<i64: 8, 128>}, {transform_indices = @transform_2, window_bounds = array<i64: 8, 128>}]} {
    %c0 = arith.constant 0 : index
    %0 = memref.load %arg1[%c0] : memref<33xf32, #tpu.memory_space<smem>>
    %c1 = arith.constant 1 : index
    %1 = memref.load %arg1[%c1] : memref<33xf32, #tpu.memory_space<smem>>
    %c2 = arith.constant 2 : index
    %2 = memref.load %arg1[%c2] : memref<33xf32, #tpu.memory_space<smem>>
    %c3 = arith.constant 3 : index
    %3 = memref.load %arg1[%c3] : memref<33xf32, #tpu.memory_space<smem>>
    %c4 = arith.constant 4 : index
    %4 = memref.load %arg1[%c4] : memref<33xf32, #tpu.memory_space<smem>>
    %c5 = arith.constant 5 : index
    %5 = memref.load %arg1[%c5] : memref<33xf32, #tpu.memory_space<smem>>
    %c6 = arith.constant 6 : index
    %6 = memref.load %arg1[%c6] : memref<33xf32, #tpu.memory_space<smem>>
    %c7 = arith.constant 7 : index
    %7 = memref.load %arg1[%c7] : memref<33xf32, #tpu.memory_space<smem>>
    %c8 = arith.constant 8 : index
    %8 = memref.load %arg1[%c8] : memref<33xf32, #tpu.memory_space<smem>>
    %c9 = arith.constant 9 : index
    %9 = memref.load %arg1[%c9] : memref<33xf32, #tpu.memory_space<smem>>
    %c10 = arith.constant 10 : index
    %10 = memref.load %arg1[%c10] : memref<33xf32, #tpu.memory_space<smem>>
    %c11 = arith.constant 11 : index
    %11 = memref.load %arg1[%c11] : memref<33xf32, #tpu.memory_space<smem>>
    %c12 = arith.constant 12 : index
    %12 = memref.load %arg1[%c12] : memref<33xf32, #tpu.memory_space<smem>>
    %c13 = arith.constant 13 : index
    %13 = memref.load %arg1[%c13] : memref<33xf32, #tpu.memory_space<smem>>
    %c14 = arith.constant 14 : index
    %14 = memref.load %arg1[%c14] : memref<33xf32, #tpu.memory_space<smem>>
    %c15 = arith.constant 15 : index
    %15 = memref.load %arg1[%c15] : memref<33xf32, #tpu.memory_space<smem>>
    %c16 = arith.constant 16 : index
    %16 = memref.load %arg1[%c16] : memref<33xf32, #tpu.memory_space<smem>>
    %c17 = arith.constant 17 : index
    %17 = memref.load %arg1[%c17] : memref<33xf32, #tpu.memory_space<smem>>
    %c18 = arith.constant 18 : index
    %18 = memref.load %arg1[%c18] : memref<33xf32, #tpu.memory_space<smem>>
    %c19 = arith.constant 19 : index
    %19 = memref.load %arg1[%c19] : memref<33xf32, #tpu.memory_space<smem>>
    %c20 = arith.constant 20 : index
    %20 = memref.load %arg1[%c20] : memref<33xf32, #tpu.memory_space<smem>>
    %c21 = arith.constant 21 : index
    %21 = memref.load %arg1[%c21] : memref<33xf32, #tpu.memory_space<smem>>
    %c22 = arith.constant 22 : index
    %22 = memref.load %arg1[%c22] : memref<33xf32, #tpu.memory_space<smem>>
    %c23 = arith.constant 23 : index
    %23 = memref.load %arg1[%c23] : memref<33xf32, #tpu.memory_space<smem>>
    %c24 = arith.constant 24 : index
    %24 = memref.load %arg1[%c24] : memref<33xf32, #tpu.memory_space<smem>>
    %c25 = arith.constant 25 : index
    %25 = memref.load %arg1[%c25] : memref<33xf32, #tpu.memory_space<smem>>
    %c26 = arith.constant 26 : index
    %26 = memref.load %arg1[%c26] : memref<33xf32, #tpu.memory_space<smem>>
    %c27 = arith.constant 27 : index
    %27 = memref.load %arg1[%c27] : memref<33xf32, #tpu.memory_space<smem>>
    %c28 = arith.constant 28 : index
    %28 = memref.load %arg1[%c28] : memref<33xf32, #tpu.memory_space<smem>>
    %c29 = arith.constant 29 : index
    %29 = memref.load %arg1[%c29] : memref<33xf32, #tpu.memory_space<smem>>
    %c30 = arith.constant 30 : index
    %30 = memref.load %arg1[%c30] : memref<33xf32, #tpu.memory_space<smem>>
    %c31 = arith.constant 31 : index
    %31 = memref.load %arg1[%c31] : memref<33xf32, #tpu.memory_space<smem>>
    %c32 = arith.constant 32 : index
    %32 = memref.load %arg1[%c32] : memref<33xf32, #tpu.memory_space<smem>>
    %c0_0 = arith.constant 0 : index
    %c0_1 = arith.constant 0 : index
    %33 = vector.load %arg2[%c0_0, %c0_1] : memref<8x128xf32, #tpu.memory_space<vmem>>, vector<8x128xf32>
    %34 = vector.broadcast %0 : f32 to vector<8x128xf32>
    %35 = arith.mulf %33, %34 : vector<8x128xf32>
    %36 = vector.broadcast %4 : f32 to vector<8x128xf32>
    %37 = arith.addf %35, %36 : vector<8x128xf32>
    %38 = math.tanh %37 : vector<8x128xf32>
    %39 = vector.broadcast %1 : f32 to vector<8x128xf32>
    %40 = arith.mulf %33, %39 : vector<8x128xf32>
    %41 = vector.broadcast %5 : f32 to vector<8x128xf32>
    %42 = arith.addf %40, %41 : vector<8x128xf32>
    %43 = math.tanh %42 : vector<8x128xf32>
    %44 = vector.broadcast %2 : f32 to vector<8x128xf32>
    %45 = arith.mulf %33, %44 : vector<8x128xf32>
    %46 = vector.broadcast %6 : f32 to vector<8x128xf32>
    %47 = arith.addf %45, %46 : vector<8x128xf32>
    %48 = math.tanh %47 : vector<8x128xf32>
    %49 = vector.broadcast %3 : f32 to vector<8x128xf32>
    %50 = arith.mulf %33, %49 : vector<8x128xf32>
    %51 = vector.broadcast %7 : f32 to vector<8x128xf32>
    %52 = arith.addf %50, %51 : vector<8x128xf32>
    %53 = math.tanh %52 : vector<8x128xf32>
    %54 = vector.broadcast %8 : f32 to vector<8x128xf32>
    %55 = arith.mulf %38, %54 : vector<8x128xf32>
    %56 = vector.broadcast %24 : f32 to vector<8x128xf32>
    %57 = arith.addf %55, %56 : vector<8x128xf32>
    %58 = vector.broadcast %12 : f32 to vector<8x128xf32>
    %59 = arith.mulf %43, %58 : vector<8x128xf32>
    %60 = arith.addf %57, %59 : vector<8x128xf32>
    %61 = vector.broadcast %16 : f32 to vector<8x128xf32>
    %62 = arith.mulf %48, %61 : vector<8x128xf32>
    %63 = arith.addf %60, %62 : vector<8x128xf32>
    %64 = vector.broadcast %20 : f32 to vector<8x128xf32>
    %65 = arith.mulf %53, %64 : vector<8x128xf32>
    %66 = arith.addf %63, %65 : vector<8x128xf32>
    %67 = math.tanh %66 : vector<8x128xf32>
    %68 = vector.broadcast %9 : f32 to vector<8x128xf32>
    %69 = arith.mulf %38, %68 : vector<8x128xf32>
    %70 = vector.broadcast %25 : f32 to vector<8x128xf32>
    %71 = arith.addf %69, %70 : vector<8x128xf32>
    %72 = vector.broadcast %13 : f32 to vector<8x128xf32>
    %73 = arith.mulf %43, %72 : vector<8x128xf32>
    %74 = arith.addf %71, %73 : vector<8x128xf32>
    %75 = vector.broadcast %17 : f32 to vector<8x128xf32>
    %76 = arith.mulf %48, %75 : vector<8x128xf32>
    %77 = arith.addf %74, %76 : vector<8x128xf32>
    %78 = vector.broadcast %21 : f32 to vector<8x128xf32>
    %79 = arith.mulf %53, %78 : vector<8x128xf32>
    %80 = arith.addf %77, %79 : vector<8x128xf32>
    %81 = math.tanh %80 : vector<8x128xf32>
    %82 = vector.broadcast %10 : f32 to vector<8x128xf32>
    %83 = arith.mulf %38, %82 : vector<8x128xf32>
    %84 = vector.broadcast %26 : f32 to vector<8x128xf32>
    %85 = arith.addf %83, %84 : vector<8x128xf32>
    %86 = vector.broadcast %14 : f32 to vector<8x128xf32>
    %87 = arith.mulf %43, %86 : vector<8x128xf32>
    %88 = arith.addf %85, %87 : vector<8x128xf32>
    %89 = vector.broadcast %18 : f32 to vector<8x128xf32>
    %90 = arith.mulf %48, %89 : vector<8x128xf32>
    %91 = arith.addf %88, %90 : vector<8x128xf32>
    %92 = vector.broadcast %22 : f32 to vector<8x128xf32>
    %93 = arith.mulf %53, %92 : vector<8x128xf32>
    %94 = arith.addf %91, %93 : vector<8x128xf32>
    %95 = math.tanh %94 : vector<8x128xf32>
    %96 = vector.broadcast %11 : f32 to vector<8x128xf32>
    %97 = arith.mulf %38, %96 : vector<8x128xf32>
    %98 = vector.broadcast %27 : f32 to vector<8x128xf32>
    %99 = arith.addf %97, %98 : vector<8x128xf32>
    %100 = vector.broadcast %15 : f32 to vector<8x128xf32>
    %101 = arith.mulf %43, %100 : vector<8x128xf32>
    %102 = arith.addf %99, %101 : vector<8x128xf32>
    %103 = vector.broadcast %19 : f32 to vector<8x128xf32>
    %104 = arith.mulf %48, %103 : vector<8x128xf32>
    %105 = arith.addf %102, %104 : vector<8x128xf32>
    %106 = vector.broadcast %23 : f32 to vector<8x128xf32>
    %107 = arith.mulf %53, %106 : vector<8x128xf32>
    %108 = arith.addf %105, %107 : vector<8x128xf32>
    %109 = math.tanh %108 : vector<8x128xf32>
    %110 = vector.broadcast %28 : f32 to vector<8x128xf32>
    %111 = arith.mulf %67, %110 : vector<8x128xf32>
    %112 = vector.broadcast %29 : f32 to vector<8x128xf32>
    %113 = arith.mulf %81, %112 : vector<8x128xf32>
    %114 = arith.addf %111, %113 : vector<8x128xf32>
    %115 = vector.broadcast %30 : f32 to vector<8x128xf32>
    %116 = arith.mulf %95, %115 : vector<8x128xf32>
    %117 = arith.addf %114, %116 : vector<8x128xf32>
    %118 = vector.broadcast %31 : f32 to vector<8x128xf32>
    %119 = arith.mulf %109, %118 : vector<8x128xf32>
    %120 = arith.addf %117, %119 : vector<8x128xf32>
    %121 = vector.broadcast %32 : f32 to vector<8x128xf32>
    %122 = arith.addf %120, %121 : vector<8x128xf32>
    %c0_2 = arith.constant 0 : index
    %c0_3 = arith.constant 0 : index
    %123 = vector.load %arg3[%c0_2, %c0_3] : memref<8x128xf32, #tpu.memory_space<vmem>>, vector<8x128xf32>
    tpu.vector_store %arg3[%c0_2, %c0_3], %122 {strides = array<i32>} : memref<8x128xf32, #tpu.memory_space<vmem>>, vector<8x128xf32>,
    return
  }
  func.func @transform_0(%arg0: i32) -> i32 {
    %c0_i32 = arith.constant 0 : i32
    %c0_i32_0 = arith.constant 0 : i32
    return %c0_i32 : i32
  }
  func.func @transform_1(%arg0: i32) -> (i32, i32) {
    %c0_i32 = arith.constant 0 : i32
    %c0_i32_0 = arith.constant 0 : i32
    return %arg0, %c0_i32 : i32, i32
  }
  func.func @transform_2(%arg0: i32) -> (i32, i32) {
    %c0_i32 = arith.constant 0 : i32
    %c0_i32_0 = arith.constant 0 : i32
    return %arg0, %c0_i32 : i32, i32
  }
}

</mosaic_0001>

<bundles_post_ra>
// kernel: tpu_custom_call.1
= control target key start
LH: loop header
LB: loop body
LE: loop exit
PB: predicated region body
PF: predicated region fallthrough
CT: control target
= control target key end

     0   :  { %7 = vsyncpa [#allocation5], 0  ;;  %s367_s0 = inlined_call_operand.hbm [shape: f32[33], index: 0, kind: input, shape index: {}]   ;;  %s368_s1 = inlined_call_operand.hbm [shape: f32[8,128], index: 1, kind: input, shape index: {}]   ;;  %s369_s2 = inlined_call_operand.hbm [shape: f32[8,128], index: 2, kind: output, shape index: {}]  }
   0x1   :  { %8 = vsyncpa [#allocation3], 0 }
   0x2   :  { %9 = vsyncpa [#allocation4], 0  ;;  %s280_s9 = smov [#allocation2]   ;;  %s281_s12 = smov [#allocation6]  }
   0x3   :  { %17 = dma.hbm_to_smem %s367_s0, 16, %s280_s9, [#allocation5]  }
   0x4   :  { %s24_s13 = sshll.u32 %s281_s12, 4  ;;  %s25_s13 = int_to_ptr.vmem [resolvable:$true] %s24_s13 }
   0x5   :  { %s242_s14 = scalar_lea.vmem %s25_s13, 128  ;;  %p247_p1 = scmp.lt.s32.totalorder %s25_s13, %s25_s13 }
   0x6   :  { %p243_p0 = scmp.ne.s32.totalorder %s25_s13, %s242_s14  ;;  %p248_p2 = scmp.lt.s32.totalorder %s242_s14, %s242_s14 }
   0x8   :  { %p249_p3 = por %p248_p2, %p247_p1 }
   0xa   :  { %p250_p4 = pnand %p249_p3, %p243_p0 }
   0xc   :  { %253 = shalt.err (!%p250_p4)
}
   0xd   :  { %27 = dma.hbm_to_vmem [thread:$0]  %s368_s1, 128, %s25_s13, [#allocation3]  }
   0xe   :  { %274 = dma.done.wait [#allocation5], 16  }
   0xf   :  { %275 = vsyncadd [#allocation5], 4294967280 }
  0x10   :  { %276 = dma.done.wait [#allocation3], 128  }
  0x11   :  { %277 = vsyncadd [#allocation3], 4294967168 }
  0x12   :  { %34 = sfence }
  0x13   :  { %s35_s0 = sld [smem:[#allocation2]]  ;;  %v68_v0 = vld [vmem:[#allocation6] sm:$0xff] }
  0x14   :  { %s175_s17 = sld [smem:[#allocation2 + $0x1]] }
  0x15   :  { %s176_s18 = sld [smem:[#allocation2 + $0x2]] }
  0x16   :  { %s177_s19 = sld [smem:[#allocation2 + $0x3]] }
  0x17   :  { %s178_s20 = sld [smem:[#allocation2 + $0x4]] }
  0x18   :  { %s179_s21 = sld [smem:[#allocation2 + $0x5]] }
  0x19   :  { %s180_s22 = sld [smem:[#allocation2 + $0x6]]  ;;  %v69_v1 = vstv %s35_s0 }
  0x1a   :  { %s181_s23 = sld [smem:[#allocation2 + $0x7]]  ;;  %v70_v2 = vmul.f32 %v69_v1, %v68_v0  ;;  %v74_v3 = vstv %s175_s17 }
  0x1b   :  { %s304_s24 = sld [smem:[#allocation2 + $0x8]]  ;;  %v75_v4 = vmul.f32 %v74_v3, %v68_v0  ;;  %v79_v5 = vstv %s176_s18 }
  0x1c   :  { %s306_s1 = sld [smem:[#allocation2 + $0x9]]  ;;  %v80_v6 = vmul.f32 %v79_v5, %v68_v0  ;;  %v84_v7 = vstv %s177_s19  ;;  %s282_s19 = smov [#allocation7]  }
  0x1d   :  { %s308_s25 = sld [smem:[#allocation2 + $0xa]]  ;;  %v71_v8 = vstv %s178_s20  ;;  %v85_v9 = vmul.f32 %v84_v7, %v68_v0  ;;  %s165_s20 = sshll.u32 %s282_s19, 4  ;;  %s166_s20 = int_to_ptr.vmem [resolvable:$true] %s165_s20 }
  0x1e   :  { %s310_s26 = sld [smem:[#allocation2 + $0xb]]  ;;  %v72_v10 = vadd.f32 %v71_v8, %v70_v2  ;;  %v76_v11 = vstv %s179_s21  ;;  %s254_s21 = scalar_lea.vmem %s166_s20, 128 }
  0x1f   :  { %s312_s27 = sld [smem:[#allocation2 + $0xc]]  ;;  %v77_v12 = vadd.f32 %v76_v11, %v75_v4  ;;  %v81_v13 = vstv %s180_s22  ;;  %p255_p5 = scmp.ne.s32.totalorder %s166_s20, %s254_s21 }
  0x20   :  { %s314_s28 = sld [smem:[#allocation2 + $0xd]]  ;;  %210 = vtanh.f32 %v72_v10  ;;  %v82_v14 = vadd.f32 %v81_v13, %v80_v6  ;;  %v86_v15 = vstv %s181_s23  ;;  %p259_p6 = scmp.lt.s32.totalorder %s166_s20, %s166_s20 }
  0x21   :  { %s316_s29 = sld [smem:[#allocation2 + $0xe]]  ;;  %212 = vtanh.f32 %v77_v12  ;;  %v87_v16 = vadd.f32 %v86_v15, %v85_v9  ;;  %v89_v17 = vstv %s304_s24  ;;  %p260_p7 = scmp.lt.s32.totalorder %s254_s21, %s254_s21 }
  0x22   :  { %s318_s30 = sld [smem:[#allocation2 + $0xf]]  ;;  %214 = vtanh.f32 %v82_v14  ;;  %v103_v18 = vstv %s306_s1 }
  0x23   :  { %s320_s3 = sld [smem:[#allocation2 + $0x10]]  ;;  %216 = vtanh.f32 %v87_v16  ;;  %v117_v19 = vstv %s308_s25  ;;  %p261_p8 = por %p260_p7, %p259_p6 }
  0x24   :  { %s322_s4 = sld [smem:[#allocation2 + $0x11]]  ;;  %v131_v20 = vstv %s310_s26 }
  0x25   :  { %s324_s5 = sld [smem:[#allocation2 + $0x12]]  ;;  %v93_v22 = vstv %s312_s27  ;;  %p262_p9 = pnand %p261_p8, %p255_p5 }
  0x26   :  { %s326_s6 = sld [smem:[#allocation2 + $0x13]]  ;;  %v107_v23 = vstv %s314_s28 }
  0x27   :  { %s328_s7 = sld [smem:[#allocation2 + $0x14]]  ;;  %v121_v24 = vstv %s316_s29 }
  0x28   :  { %s330_s8 = sld [smem:[#allocation2 + $0x15]]  ;;  %v135_v25 = vstv %s318_s30 }
  0x29   :  { %s332_s9 = sld [smem:[#allocation2 + $0x16]]  ;;  %v96_v28 = vstv %s320_s3 }
  0x2a   :  { %s334_s10 = sld [smem:[#allocation2 + $0x17]]  ;;  %v110_v29 = vstv %s322_s4 }
  0x2b   :  { %s336_s11 = sld [smem:[#allocation2 + $0x18]]  ;;  %v124_v30 = vstv %s324_s5 }
  0x2c   :  { %s339_s12 = sld [smem:[#allocation2 + $0x19]]  ;;  %v138_v35 = vstv %s326_s6 }
  0x2d   :  { %v211_v21 = vpop.eup %210  ;;  %s344_s13 = sld [smem:[#allocation2 + $0x1a]]  ;;  %v99_v32 = vstv %s328_s7 }
  0x2e   :  { %v213_v26 = vpop.eup %212  ;;  %s350_s14 = sld [smem:[#allocation2 + $0x1b]]  ;;  %v90_v27 = vmul.f32 %v211_v21, %v89_v17  ;;  %v104_v33 = vmul.f32 %v211_v21, %v103_v18  ;;  %v113_v34 = vstv %s330_s8  ;;  %v118_v39 = vmul.f32 %v211_v21, %v117_v19 }
  0x2f   :  { %v215_v31 = vpop.eup %214  ;;  %v94_v37 = vmul.f32 %v213_v26, %v93_v22  ;;  %v108_v38 = vmul.f32 %v213_v26, %v107_v23  ;;  %v122_v40 = vmul.f32 %v213_v26, %v121_v24  ;;  %v127_v43 = vstv %s332_s9  ;;  %s202_s15 = sld [smem:[#allocation2 + $0x1c]] }
  0x30   :  { %v217_v36 = vpop.eup %216  ;;  %v97_v42 = vmul.f32 %v215_v31, %v96_v28  ;;  %v132_v44 = vmul.f32 %v211_v21, %v131_v20  ;;  %v111_v47 = vmul.f32 %v215_v31, %v110_v29  ;;  %v125_v48 = vmul.f32 %v215_v31, %v124_v30  ;;  %s203_s16 = sld [smem:[#allocation2 + $0x1d]] }
  0x31   :  { %v91_v41 = vstv %s336_s11  ;;  %v100_v49 = vmul.f32 %v217_v36, %v99_v32  ;;  %v136_v52 = vmul.f32 %v213_v26, %v135_v25  ;;  %v141_v56 = vstv %s334_s10  ;;  %s204_s0 = sld [smem:[#allocation2 + $0x1e]] }
  0x32   :  { %v92_v45 = vadd.f32 %v91_v41, %v90_v27  ;;  %v105_v46 = vstv %s339_s12  ;;  %v114_v58 = vmul.f32 %v217_v36, %v113_v34  ;;  %v139_v60 = vmul.f32 %v215_v31, %v138_v35  ;;  %s205_s17 = sld [smem:[#allocation2 + $0x1f]] }
  0x33   :  { %v106_v50 = vadd.f32 %v105_v46, %v104_v33  ;;  %v119_v51 = vstv %s344_s13  ;;  %v128_v63 = vmul.f32 %v217_v36, %v127_v43  ;;  %v142_v2 = vmul.f32 %v217_v36, %v141_v56  ;;  %s206_s18 = sld [smem:[#allocation2 + $0x20]] }
  0x34   :  { %v95_v53 = vadd.f32 %v94_v37, %v92_v45  ;;  %v120_v54 = vadd.f32 %v119_v51, %v118_v39  ;;  %v133_v55 = vstv %s350_s14 }
  0x35   :  { %v109_v57 = vadd.f32 %v108_v38, %v106_v50  ;;  %v134_v59 = vadd.f32 %v133_v55, %v132_v44  ;;  %v145_v9 = vstv %s202_s15 }
  0x36   :  { %v98_v61 = vadd.f32 %v97_v42, %v95_v53  ;;  %v123_v62 = vadd.f32 %v122_v40, %v120_v54  ;;  %v147_v10 = vstv %s203_s16 }
  0x37   :  { %v112_v0 = vadd.f32 %v111_v47, %v109_v57  ;;  %v137_v1 = vadd.f32 %v136_v52, %v134_v59  ;;  %v150_v12 = vstv %s204_s0 }
  0x38   :  { %v101_v3 = vadd.f32 %v100_v49, %v98_v61  ;;  %v126_v4 = vadd.f32 %v125_v48, %v123_v62  ;;  %v153_v15 = vstv %s205_s17 }
  0x39   :  { %v115_v5 = vadd.f32 %v114_v58, %v112_v0  ;;  %v140_v6 = vadd.f32 %v139_v60, %v137_v1  ;;  %v156_v23 = vstv %s206_s18 }
  0x3a   :  { %218 = vtanh.f32 %v101_v3  ;;  %v129_v7 = vadd.f32 %v128_v63, %v126_v4 }
  0x3b   :  { %220 = vtanh.f32 %v115_v5  ;;  %v143_v8 = vadd.f32 %v142_v2, %v140_v6 }
  0x3c   :  { %222 = vtanh.f32 %v129_v7 }
  0x3d   :  { %224 = vtanh.f32 %v143_v8 }
  0x47   :  { %v219_v11 = vpop.eup %218 }
  0x48   :  { %v221_v13 = vpop.eup %220  ;;  %v146_v14 = vmul.f32 %v219_v11, %v145_v9 }
  0x49   :  { %v223_v16 = vpop.eup %222  ;;  %v148_v17 = vmul.f32 %v221_v13, %v147_v10 }
  0x4a   :  { %v225_v18 = vpop.eup %224  ;;  %v151_v19 = vmul.f32 %v223_v16, %v150_v12 }
  0x4b   :  { %v149_v20 = vadd.f32 %v148_v17, %v146_v14  ;;  %v154_v21 = vmul.f32 %v225_v18, %v153_v15 }
  0x4d   :  { %v152_v22 = vadd.f32 %v151_v19, %v149_v20 }
  0x4f   :  { %v155_v24 = vadd.f32 %v154_v21, %v152_v22 }
  0x51   :  { %v157_v25 = vadd.f32 %v156_v23, %v155_v24 }
  0x53   :  { %158 = vst [vmem:[#allocation7] sm:$0xff] %v157_v25 }
  0x54   :  { %265 = shalt.err (!%p262_p9)
}
  0x55   :  { %168 = dma.vmem_to_hbm [thread:$0]  %s166_s20, 128, %s369_s2, [#allocation4]  }
  0x56   :  { %278 = dma.done.wait [#allocation4], 128  }
  0x57   :  { %279 = vsyncadd [#allocation4], 4294967168 }
  0x58   :  { %172 = vsyncpa [#allocation3], 1 }
  0x59   :  { %173 = vsyncpa [#allocation4], 1 }
  0x5a   :  { %174 = vsyncpa [#allocation5], 1 }

</bundles_post_ra>
